<compile_context>
chip_gen: v7x
topology: tpu7x:2x2x1
jax: 0.10.0
libtpu: 0.0.40
codegen_flags: <defaults>
</compile_context>

<pallas_src>
import jax
import jax.numpy as jnp
from jax import lax
from jax.experimental import pallas as pl
from jax.experimental.pallas import tpu as pltpu


def mlp_kernel(x_ref, w1_ref, b1_ref, w2_ref, b2_ref, w3_ref, b3_ref, out_ref):
    # x_ref : (tile_b, in_dim)                     bf16 (rows = batch)
    # w1_ref: (h1, in_dim)   w2_ref: (h2, h1)      PyTorch (out, in) layout, bf16
    # b1_ref: (h1, 1)  b2_ref: (h2, 1)  w3_ref: (h2, 1)  b3_ref: (1, 1)   f32
    # out_ref: (1, tile_b)                         f32 (batch on lanes)
    x = x_ref[...]                                               # (tile_b, in_dim)

    # Layer 1 on MXU: contract in_dim (minor dim of both operands) -> (h1, tile_b).
    # dot_general dimension_numbers avoid materializing any transpose in-kernel.
    dn = (((1,), (1,)), ((), ()))
    h1 = lax.dot_general(w1_ref[...], x, dn, preferred_element_type=jnp.float32)
    h1 = jnp.maximum(h1 + b1_ref[...], 0.0)                      # f32 bias + ReLU

    # Layer 2 on MXU: (h2, h1) x (h1, tile_b) -> (h2, tile_b), canonical layout.
    h2 = jnp.dot(w2_ref[...], h1.astype(w2_ref.dtype),
                 preferred_element_type=jnp.float32)
    h2 = jnp.maximum(h2 + b2_ref[...], 0.0)

    # Layer 3 (out_dim == 1) on VPU/XLU: broadcast-multiply + sublane reduce.
    # Result is already lane-dense (1, tile_b).
    y = jnp.sum(h2 * w3_ref[...], axis=0, keepdims=True) + b3_ref[...]

    out_ref[...] = y.astype(out_ref.dtype)


def _round_up(x, m):
    return ((x + m - 1) // m) * m


def mlp_forward(x, w1, b1, w2, b2, w3, b3, *, tile_b=None):
    """Fused MLP forward.

    x : (B, in_dim)
    w1: (h1, in_dim), b1: (h1,)     -- PyTorch nn.Linear layout
    w2: (h2, h1),     b2: (h2,)
    w3: (1, h2),      b3: (1,)
    returns (B, 1) float32
    """
    B, in_dim = x.shape
    h1_dim = w1.shape[0]
    h2_dim = w2.shape[0]

    # Column-shaped params for lane-broadcast inside the kernel (tiny reshapes).
    b1c = b1.reshape(h1_dim, 1).astype(jnp.float32)
    b2c = b2.reshape(h2_dim, 1).astype(jnp.float32)
    w3c = w3.reshape(h2_dim, 1).astype(jnp.float32)
    b3c = b3.reshape(1, 1).astype(jnp.float32)

    if tile_b is None:
        # Multiple of 128 (lane width); aim for ~1024-row tiles but keep >= 2
        # grid steps when the batch is large enough (v7x megacore).
        tile_b = max(128, min(1024, _round_up(pl.cdiv(B, 2), 128)))
    assert tile_b % 128 == 0, "tile_b must be a multiple of 128"

    b_pad = _round_up(B, tile_b)
    if b_pad != B:
        x = jnp.pad(x, ((0, b_pad - B), (0, 0)))

    grid = (b_pad // tile_b,)

    out_t = pl.pallas_call(
        mlp_kernel,
        out_shape=jax.ShapeDtypeStruct((1, b_pad), jnp.float32),
        grid=grid,
        in_specs=[
            pl.BlockSpec((tile_b, in_dim), lambda i: (i, 0)),    # x tile (per step)
            pl.BlockSpec((h1_dim, in_dim), lambda i: (0, 0)),    # W1 (resident)
            pl.BlockSpec((h1_dim, 1), lambda i: (0, 0)),         # b1
            pl.BlockSpec((h2_dim, h1_dim), lambda i: (0, 0)),    # W2
            pl.BlockSpec((h2_dim, 1), lambda i: (0, 0)),         # b2
            pl.BlockSpec((h2_dim, 1), lambda i: (0, 0)),         # w3 (as column)
            pl.BlockSpec((1, 1), lambda i: (0, 0)),              # b3
        ],
        out_specs=pl.BlockSpec((1, tile_b), lambda i: (0, i)),   # lane-dense output
        compiler_params=pltpu.CompilerParams(
            dimension_semantics=("parallel",),
        ),
    )(x, w1, b1c, w2, b2c, w3c, b3c)

    return out_t[0, :B].reshape(B, 1)


def _init_linear(key, fan_in, fan_out, w_dtype):
    """Mimics torch.nn.Linear default init: U(-1/sqrt(fan_in), 1/sqrt(fan_in))."""
    kw, kb = jax.random.split(key)
    bound = fan_in ** -0.5
    w = jax.random.uniform(kw, (fan_out, fan_in), jnp.float32, -bound, bound)
    b = jax.random.uniform(kb, (fan_out,), jnp.float32, -bound, bound)
    return w.astype(w_dtype), b


def mlp_reference(x, w1, b1, w2, b2, w3, b3):
    """Pure-JAX reference mirroring the kernel's dtype choices."""
    xf = x.astype(jnp.float32)
    w1f = w1.astype(jnp.float32)
    w2f = w2.astype(jnp.float32)
    w3f = w3.astype(jnp.float32)
    h1 = jnp.maximum(xf @ w1f.T + b1[None, :], 0.0)
    h1 = h1.astype(w2.dtype).astype(jnp.float32)  # mirror the in-kernel bf16 cast
    h2 = jnp.maximum(h1 @ w2f.T + b2[None, :], 0.0)
    return h2 @ w3f.T + b3[None, :]


if __name__ == "__main__":
    # Small shapes consistent with MLP(in_dim, n_hidden_1, n_hidden_2).
    batch = 8
    in_dim, n_hidden_1, n_hidden_2 = 32, 64, 32

    key = jax.random.PRNGKey(0)
    kx, k1, k2, k3 = jax.random.split(key, 4)

    # bf16 activations / matmul weights (f32 accumulate in-kernel);
    # f32 biases and f32 final (1-wide) layer.
    x = jax.random.normal(kx, (batch, in_dim), jnp.float32).astype(jnp.bfloat16)
    w1, b1 = _init_linear(k1, in_dim, n_hidden_1, jnp.bfloat16)
    w2, b2 = _init_linear(k2, n_hidden_1, n_hidden_2, jnp.bfloat16)
    w3, b3 = _init_linear(k3, n_hidden_2, 1, jnp.float32)

    out = mlp_forward(x, w1, b1, w2, b2, w3, b3)
    out = jax.block_until_ready(out)

    ref = mlp_reference(x, w1, b1, w2, b2, w3, b3)
    assert out.shape == (batch, 1), out.shape
    max_err = float(jnp.max(jnp.abs(out - ref)))
    assert jnp.allclose(out, ref, atol=1e-2, rtol=1e-2), f"mismatch, max_err={max_err}"

    print("KERNEL_OK")
</pallas_src>

<mosaic_0001>
module attributes {stable_mosaic.version = 11 : i64} {
  func.func @mlp_kernel(%arg0: i32, %arg1: memref<128x32xbf16, #tpu.memory_space<vmem>>, %arg2: memref<64x32xbf16, #tpu.memory_space<vmem>>, %arg3: memref<64x1xf32, #tpu.memory_space<vmem>>, %arg4: memref<32x64xbf16, #tpu.memory_space<vmem>>, %arg5: memref<32x1xf32, #tpu.memory_space<vmem>>, %arg6: memref<32x1xf32, #tpu.memory_space<vmem>>, %arg7: memref<1x1xf32, #tpu.memory_space<vmem>>, %arg8: memref<1x128xf32, #tpu.memory_space<vmem>>) attributes {dimension_semantics = [#tpu.dimension_semantics<parallel>], iteration_bounds = array<i64: 1>, scalar_prefetch = 0 : i64, scratch_operands = 0 : i64, tpu.core_type = #tpu.core_type<tc>, window_params = [{transform_indices = @transform_0, window_bounds = array<i64: 128, 32>}, {pipeline_mode = #tpu.pipeline_mode<synchronous>, transform_indices = @transform_1, window_bounds = array<i64: 64, 32>}, {pipeline_mode = #tpu.pipeline_mode<synchronous>, transform_indices = @transform_2, window_bounds = array<i64: 64, 1>}, {pipeline_mode = #tpu.pipeline_mode<synchronous>, transform_indices = @transform_3, window_bounds = array<i64: 32, 64>}, {pipeline_mode = #tpu.pipeline_mode<synchronous>, transform_indices = @transform_4, window_bounds = array<i64: 32, 1>}, {pipeline_mode = #tpu.pipeline_mode<synchronous>, transform_indices = @transform_5, window_bounds = array<i64: 32, 1>}, {pipeline_mode = #tpu.pipeline_mode<synchronous>, transform_indices = @transform_6, window_bounds = array<i64: 1, 1>}, {transform_indices = @transform_7, window_bounds = array<i64: 1, 128>}]} {
    %c0 = arith.constant 0 : index
    %c0_0 = arith.constant 0 : index
    %0 = vector.load %arg1[%c0, %c0_0] : memref<128x32xbf16, #tpu.memory_space<vmem>>, vector<128x32xbf16>
    %c0_1 = arith.constant 0 : index
    %c0_2 = arith.constant 0 : index
    %1 = vector.load %arg2[%c0_1, %c0_2] : memref<64x32xbf16, #tpu.memory_space<vmem>>, vector<64x32xbf16>
    %cst = arith.constant dense<0.000000e+00> : vector<64x128xf32>
    %2 = tpu.matmul %1, %0, %cst {dimension_numbers = #tpu.dot_dimension_numbers<[1], [1], [0], [0], [0, 0, 1, 0], [], []>} : vector<64x32xbf16>, vector<128x32xbf16>, vector<64x128xf32> -> vector<64x128xf32>
    %c0_3 = arith.constant 0 : index
    %c0_4 = arith.constant 0 : index
    %3 = vector.load %arg3[%c0_3, %c0_4] : memref<64x1xf32, #tpu.memory_space<vmem>>, vector<64x1xf32>
    %4 = vector.broadcast %3 : vector<64x1xf32> to vector<64x128xf32>
    %5 = arith.addf %2, %4 : vector<64x128xf32>
    %cst_5 = arith.constant 0.000000e+00 : f32
    %6 = vector.broadcast %cst_5 : f32 to vector<64x128xf32>
    %7 = arith.maximumf %5, %6 : vector<64x128xf32>
    %c0_6 = arith.constant 0 : index
    %c0_7 = arith.constant 0 : index
    %8 = vector.load %arg4[%c0_6, %c0_7] : memref<32x64xbf16, #tpu.memory_space<vmem>>, vector<32x64xbf16>
    %9 = arith.truncf %7 : vector<64x128xf32> to vector<64x128xbf16>
    %cst_8 = arith.constant dense<0.000000e+00> : vector<32x128xf32>
    %10 = tpu.matmul %8, %9, %cst_8 {dimension_numbers = #tpu.dot_dimension_numbers<[1], [0], [0], [1], [0, 0, 1, 1], [], []>} : vector<32x64xbf16>, vector<64x128xbf16>, vector<32x128xf32> -> vector<32x128xf32>
    %c0_9 = arith.constant 0 : index
    %c0_10 = arith.constant 0 : index
    %11 = vector.load %arg5[%c0_9, %c0_10] : memref<32x1xf32, #tpu.memory_space<vmem>>, vector<32x1xf32>
    %12 = vector.broadcast %11 : vector<32x1xf32> to vector<32x128xf32>
    %13 = arith.addf %10, %12 : vector<32x128xf32>
    %cst_11 = arith.constant 0.000000e+00 : f32
    %14 = vector.broadcast %cst_11 : f32 to vector<32x128xf32>
    %15 = arith.maximumf %13, %14 : vector<32x128xf32>
    %c0_12 = arith.constant 0 : index
    %c0_13 = arith.constant 0 : index
    %16 = vector.load %arg6[%c0_12, %c0_13] : memref<32x1xf32, #tpu.memory_space<vmem>>, vector<32x1xf32>
    %17 = vector.broadcast %16 : vector<32x1xf32> to vector<32x128xf32>
    %18 = arith.mulf %15, %17 : vector<32x128xf32>
    %cst_14 = arith.constant dense<0.000000e+00> : vector<128xf32>
    %19 = vector.multi_reduction <add>, %18, %cst_14 [0] : vector<32x128xf32> to vector<128xf32>
    %20 = vector.shape_cast %19 : vector<128xf32> to vector<1x128xf32>
    %c0_15 = arith.constant 0 : index
    %c0_16 = arith.constant 0 : index
    %21 = vector.load %arg7[%c0_15, %c0_16] : memref<1x1xf32, #tpu.memory_space<vmem>>, vector<1x1xf32>
    %22 = vector.broadcast %21 : vector<1x1xf32> to vector<1x128xf32>
    %23 = arith.addf %20, %22 : vector<1x128xf32>
    %c0_17 = arith.constant 0 : index
    %c0_18 = arith.constant 0 : index
    %24 = vector.load %arg8[%c0_17, %c0_18] : memref<1x128xf32, #tpu.memory_space<vmem>>, vector<1x128xf32>
    tpu.vector_store %arg8[%c0_17, %c0_18], %23 {strides = array<i32>} : memref<1x128xf32, #tpu.memory_space<vmem>>, vector<1x128xf32>,
    return
  }
  func.func @transform_0(%arg0: i32) -> (i32, i32) {
    %c0_i32 = arith.constant 0 : i32
    %c0_i32_0 = arith.constant 0 : i32
    return %arg0, %c0_i32 : i32, i32
  }
  func.func @transform_1(%arg0: i32) -> (i32, i32) {
    %c0_i32 = arith.constant 0 : i32
    %c0_i32_0 = arith.constant 0 : i32
    %c0_i32_1 = arith.constant 0 : i32
    return %c0_i32, %c0_i32_0 : i32, i32
  }
  func.func @transform_2(%arg0: i32) -> (i32, i32) {
    %c0_i32 = arith.constant 0 : i32
    %c0_i32_0 = arith.constant 0 : i32
    %c0_i32_1 = arith.constant 0 : i32
    return %c0_i32, %c0_i32_0 : i32, i32
  }
  func.func @transform_3(%arg0: i32) -> (i32, i32) {
    %c0_i32 = arith.constant 0 : i32
    %c0_i32_0 = arith.constant 0 : i32
    %c0_i32_1 = arith.constant 0 : i32
    return %c0_i32, %c0_i32_0 : i32, i32
  }
  func.func @transform_4(%arg0: i32) -> (i32, i32) {
    %c0_i32 = arith.constant 0 : i32
    %c0_i32_0 = arith.constant 0 : i32
    %c0_i32_1 = arith.constant 0 : i32
    return %c0_i32, %c0_i32_0 : i32, i32
  }
  func.func @transform_5(%arg0: i32) -> (i32, i32) {
    %c0_i32 = arith.constant 0 : i32
    %c0_i32_0 = arith.constant 0 : i32
    %c0_i32_1 = arith.constant 0 : i32
    return %c0_i32, %c0_i32_0 : i32, i32
  }
  func.func @transform_6(%arg0: i32) -> (i32, i32) {
    %c0_i32 = arith.constant 0 : i32
    %c0_i32_0 = arith.constant 0 : i32
    %c0_i32_1 = arith.constant 0 : i32
    return %c0_i32, %c0_i32_0 : i32, i32
  }
  func.func @transform_7(%arg0: i32) -> (i32, i32) {
    %c0_i32 = arith.constant 0 : i32
    %c0_i32_0 = arith.constant 0 : i32
    return %c0_i32, %arg0 : i32, i32
  }
}

</mosaic_0001>

<bundles_post_ra>
// kernel: tpu_custom_call.1
= control target key start
LH: loop header
LB: loop body
LE: loop exit
PB: predicated region body
PF: predicated region fallthrough
CT: control target
= control target key end

     0   :  { %s730_s0 = inlined_call_operand.vmem [shape: bf16[128,32], index: 0, kind: input, shape index: {}]   ;;  %s731_s1 = inlined_call_operand.vmem [shape: bf16[64,32], index: 1, kind: input, shape index: {}]   ;;  %s732_s2 = inlined_call_operand.vmem [shape: f32[64,1], index: 2, kind: input, shape index: {}]   ;;  %s733_s3 = inlined_call_operand.vmem [shape: bf16[32,64], index: 3, kind: input, shape index: {}]   ;;  %s734_s4 = inlined_call_operand.vmem [shape: f32[32,1], index: 4, kind: input, shape index: {}]   ;;  %s735_s5 = inlined_call_operand.vmem [shape: f32[32,1], index: 5, kind: input, shape index: {}]   ;;  %s736_s6 = inlined_call_operand.<no memory space> [shape: f32[1,1], index: 6, kind: input, shape index: {}]   ;;  %s737_s7 = inlined_call_operand.hbm [shape: f32[1,128], index: 7, kind: output, shape index: {}]  }
   0x1   :  { %v12_v0 = vstv %s736_s6 }
   0x2   :  { %13 = vst [vmem:[#allocation2] sm:$0x1] %v12_v0 }
   0x3   :  { %v523_v1 = vld [vmem:[%s730_s0] sm:$0xff]   ;;  %vm162_vm0 = vcmask 261120   ;;  %v524_v2 = vld [vmem:[%s730_s0 + $0x8] sm:$0xff]   ;;  %v561_v4 = vmov 0   ;;  %v525_v5 = vld [vmem:[%s730_s0 + $0x10] sm:$0xff]  }
   0x4   :  { %511 = vmatprep.subr.msk.bf16.mxu0 %vm162_vm0, %v523_v1  ;;  %v176_v3 = vsel %vm162_vm0, %v523_v1, 0  ;;  %521 = vset.pattern.permute.xlu0 %v561_v4  ;;  %v179_v6 = vsel %vm162_vm0, %v524_v2, 0  ;;  %v531_v7 = vld [vmem:[%s731_s1] sm:$0xff]   ;;  %v56_v9 = vld [vmem:[%s732_s2 + $0x10] sm:$0xff]  ;;  %v55_v10 = vld [vmem:[%s732_s2 + $0x8] sm:$0xff]  ;;  %v182_v12 = vsel %vm162_vm0, %v525_v5, 0 }
   0x5   :  { %476 = vmatpush3.bf16.xpose.msra.mxu0 %v176_v3  ;;  %522 = vset.pattern.permute.xlu1 %v561_v4  ;;  %v54_v8 = vld [vmem:[%s732_s2] sm:$0xff]  ;;  %v57_v11 = vld [vmem:[%s732_s2 + $0x18] sm:$0xff]  ;;  %v59_v15 = vld [vmem:[%s732_s2 + $0x28] sm:$0xff] }
   0x6   :  { %512 = vmatprep.subr.msk.bf16.mxu0 %vm162_vm0, %v524_v2  ;;  %491 = vmatprep.mubr.msk.bf16.mxu0 %vm162_vm0, %v531_v7  ;;  %v526_v13 = vld [vmem:[%s730_s0 + $0x18] sm:$0xff]   ;;  %v58_v14 = vld [vmem:[%s732_s2 + $0x20] sm:$0xff] }
   0x7   :  { %64 = vperm.xlu0 %521, %v54_v8   ;;  %74 = vperm.xlu1 %522, %v56_v9  }
   0xb   :  { %69 = vperm.xlu0 %521, %v55_v10   ;;  %79 = vperm.xlu1 %522, %v57_v11  }
   0xd   :  { %478 = vmatpush3.bf16.xpose.msra.mxu0 %v179_v6 }
   0xe   :  { %513 = vmatprep.subr.msk.bf16.mxu0 %vm162_vm0, %v525_v5 }
  0x15   :  { %480 = vmatpush3.bf16.xpose.msra.mxu0 %v182_v12 }
  0x16   :  { %14 = vsyncpa [#allocation4], 0  ;;  %514 = vmatprep.subr.msk.bf16.mxu0 %vm162_vm0, %v526_v13  ;;  %84 = vperm.xlu0 %521, %v58_v14   ;;  %v60_v16 = vld [vmem:[%s732_s2 + $0x30] sm:$0xff]  ;;  %v61_v17 = vld [vmem:[%s732_s2 + $0x38] sm:$0xff]  ;;  %v185_v18 = vsel %vm162_vm0, %v526_v13, 0  ;;  %vm314_vm1 = vcmask 523264  }
  0x17   :  { %89 = vperm.xlu1 %522, %v59_v15   ;;  %v527_v19 = vld [vmem:[%s730_s0 + $0x20] sm:$0xff]   ;;  %v281_v21 = vld [vmem:[%s734_s4 + $0x8] sm:$0xff]  ;;  %v282_v22 = vld [vmem:[%s734_s4 + $0x10] sm:$0xff] }
  0x18   :  { %v280_v20 = vld [vmem:[%s734_s4] sm:$0xff]  ;;  %v283_v23 = vld [vmem:[%s734_s4 + $0x18] sm:$0xff]  ;;  %v188_v24 = vsel %vm162_vm0, %v527_v19, 0  ;;  %v528_v25 = vld [vmem:[%s730_s0 + $0x28] sm:$0xff]  }
  0x19   :  { %v374_v26 = vld [vmem:[%s735_s5] sm:$0xff]  ;;  %v375_v27 = vld [vmem:[%s735_s5 + $0x8] sm:$0xff]  ;;  %v376_v28 = vld [vmem:[%s735_s5 + $0x10] sm:$0xff]  ;;  %v191_v30 = vsel %vm162_vm0, %v528_v25, 0 }
  0x1a   :  { %94 = vperm.xlu0 %521, %v60_v16   ;;  %v377_v29 = vld [vmem:[%s735_s5 + $0x18] sm:$0xff]  ;;  %v529_v31 = vld [vmem:[%s730_s0 + $0x30] sm:$0xff]   ;;  %v411_v32 = vld [vmem:[#allocation2] sm:$0x1] }
  0x1b   :  { %99 = vperm.xlu1 %522, %v61_v17   ;;  %v194_v33 = vsel %vm162_vm0, %v529_v31, 0  ;;  %v530_v34 = vld [vmem:[%s730_s0 + $0x38] sm:$0xff]   ;;  %v532_v36 = vld [vmem:[%s731_s1 + $0x8] sm:$0xff]   ;;  %v533_v37 = vld [vmem:[%s731_s1 + $0x10] sm:$0xff]  }
  0x1c   :  { %v197_v35 = vsel %vm162_vm0, %v530_v34, 0  ;;  %v534_v38 = vld [vmem:[%s731_s1 + $0x18] sm:$0xff]   ;;  %v535_v39 = vld [vmem:[%s733_s3] sm:$0xff]   ;;  %v536_v12 = vld [vmem:[%s733_s3 + $0x8] sm:$0xff]   ;;  %s562_s3 = smov [#allocation3]  }
  0x1d   :  { %482 = vmatpush3.bf16.xpose.msra.mxu0 %v185_v18  ;;  %507 = vmatprep.mubr.msk.bf16.mxu1 %vm314_vm1, %v535_v39  ;;  %v417_v39 = vlaneseq  ;;  %s429_s9 = sshll.u32 %s562_s3, 4  ;;  %s430_s9 = int_to_ptr.vmem [resolvable:$true] %s429_s9 }
  0x1e   :  { %515 = vmatprep.subr.msk.bf16.mxu0 %vm162_vm0, %v527_v19  ;;  %286 = vperm.xlu0 %521, %v280_v20   ;;  %s537_s2 = scalar_lea.vmem %s430_s9, 16  ;;  %s541_s10 = scalar_lea.vmem %s430_s9, 32 }
  0x1f   :  { %291 = vperm.xlu1 %522, %v281_v21   ;;  %p538_p0 = scmp.ne.s32.totalorder %s430_s9, %s537_s2  ;;  %p542_p1 = scmp.lt.s32.totalorder %s430_s9, %s430_s9 }
  0x20   :  { %p543_p2 = scmp.lt.s32.totalorder %s541_s10, %s537_s2 }
  0x22   :  { %296 = vperm.xlu0 %521, %v282_v22   ;;  %p544_p3 = por %p543_p2, %p542_p1 }
  0x23   :  { %301 = vperm.xlu1 %522, %v283_v23  }
  0x24   :  { %p545_p4 = pnand %p544_p3, %p538_p0 }
  0x25   :  { %484 = vmatpush3.bf16.xpose.msra.mxu0 %v188_v24 }
  0x26   :  { %516 = vmatprep.subr.msk.bf16.mxu0 %vm162_vm0, %v528_v25  ;;  %380 = vperm.xlu0 %521, %v374_v26  }
  0x27   :  { %385 = vperm.xlu1 %522, %v375_v27  }
  0x2a   :  { %390 = vperm.xlu0 %521, %v376_v28  }
  0x2b   :  { %395 = vperm.xlu1 %522, %v377_v29  }
  0x2d   :  { %486 = vmatpush3.bf16.xpose.msra.mxu0 %v191_v30 }
  0x2e   :  { %517 = vmatprep.subr.msk.bf16.mxu0 %vm162_vm0, %v529_v31  ;;  %414 = vperm.xlu0 %521, %v411_v32  }
  0x35   :  { %488 = vmatpush3.bf16.xpose.msra.mxu0 %v194_v33 }
  0x36   :  { %518 = vmatprep.subr.msk.bf16.mxu0 %vm162_vm0, %v530_v34 }
  0x3d   :  { %490 = vmatpush3.bf16.xpose.msra.mxu0 %v197_v35 }
  0x44   :  { %492 = vmatmul.mubr.msk.bf16.vlgmr.msra.gmra.mrb[0].mxu0 %vm162_vm0, %v532_v36 }
  0x45   :  { %495 = vmatprep.mubr.msk.bf16.mxu0 %vm162_vm0, %v533_v37 }
  0x4c   :  { %496 = vmatmul.mubr.msk.bf16.gmra.mrb[4].mxu0 %vm162_vm0, %v534_v38 }
  0x86   :  { %v65_v40 = vpop.permute.xlu0 %64  ;;  %v75_v41 = vpop.permute.xlu1 %74 }
  0x8a   :  { %v70_v42 = vpop.permute.xlu0 %69  ;;  %v80_v43 = vpop.permute.xlu1 %79 }
  0x95   :  { %v85_v47 = vpop.permute.xlu0 %84 }
  0x96   :  { %v90_v52 = vpop.permute.xlu1 %89 }
  0x99   :  { %v95_v59 = vpop.permute.xlu0 %94 }
  0x9a   :  { %v100_v0 = vpop.permute.xlu1 %99 }
  0x9d   :  { %v287_v13 = vpop.permute.xlu0 %286 }
  0x9e   :  { %v292_v14 = vpop.permute.xlu1 %291 }
  0xa1   :  { %v297_v15 = vpop.permute.xlu0 %296 }
  0xa2   :  { %v302_v16 = vpop.permute.xlu1 %301 }
  0xa5   :  { %v381_v22 = vpop.permute.xlu0 %380 }
  0xa6   :  { %v386_v27 = vpop.permute.xlu1 %385 }
  0xa9   :  { %v391_v33 = vpop.permute.xlu0 %390 }
  0xaa   :  { %v396_v36 = vpop.permute.xlu1 %395 }
 0x117   :  { %v493_v44 = vpop.f32.mrb[0].mxu0 }
 0x118   :  { %v242_v45 = vadd.f32 %v493_v44, %v75_v41  ;;  %v233_v46 = vpop.f32.mrb[1].mxu0 }
 0x119   :  { %v234_v48 = vadd.f32 %v233_v46, %v65_v40  ;;  %v494_v49 = vpop.f32.mrb[2].mxu0 }
 0x11a   :  { %v245_v50 = vadd.f32 %v494_v49, %v80_v43  ;;  %v236_v51 = vpop.f32.mrb[3].mxu0  ;;  %v266_v54 = vmax.f32 %v242_v45, 0.0 }
 0x11b   :  { %v237_v53 = vadd.f32 %v236_v51, %v70_v42  ;;  %v264_v56 = vmax.f32 %v234_v48, 0.0  ;;  %v418_v42 = vshrl.u32 %v417_v39, 7 }
 0x11c   :  { %v267_v55 = vmax.f32 %v245_v50, 0.0 }
 0x11d   :  { %v265_v57 = vmax.f32 %v237_v53, 0.0  ;;  %v419_v45 = vsub.s32 0, %v418_v42 }
 0x11e   :  { %v277_v58 = vpack.c.bf16 %v267_v55, %v266_v54 }
 0x11f   :  { %v497_v60 = vpop.f32.mrb[4].mxu0  ;;  %v276_v61 = vpack.c.bf16 %v265_v57, %v264_v56 }
 0x120   :  { %v258_v62 = vadd.f32 %v497_v60, %v95_v59  ;;  %v249_v63 = vpop.f32.mrb[5].mxu0 }
 0x121   :  { %v250_v1 = vadd.f32 %v249_v63, %v85_v47  ;;  %v498_v2 = vpop.f32.mrb[6].mxu0  ;;  %499 = vmatprep.subr.bf16.mxu1 %v276_v61  ;;  %v415_v47 = vpop.permute.xlu0 %414 }
 0x122   :  { %v261_v3 = vadd.f32 %v498_v2, %v100_v0  ;;  %v252_v4 = vpop.f32.mrb[7].mxu0  ;;  %500 = vmatpush3.bf16.msra.mxu1 %v276_v61  ;;  %v270_v6 = vmax.f32 %v258_v62, 0.0  ;;  %v420_v49 = vrot.slane %v415_v47, %v419_v45 }
 0x123   :  { %v253_v5 = vadd.f32 %v252_v4, %v90_v52  ;;  %501 = vmatprep.subr.bf16.mxu1 %v277_v58  ;;  %v268_v8 = vmax.f32 %v250_v1, 0.0 }
 0x124   :  { %v271_v7 = vmax.f32 %v261_v3, 0.0 }
 0x125   :  { %v269_v9 = vmax.f32 %v253_v5, 0.0 }
 0x126   :  { %v279_v10 = vpack.c.bf16 %v271_v7, %v270_v6  ;;  %502 = vmatpush3.bf16.msra.mxu1 %v277_v58 }
 0x127   :  { %v278_v11 = vpack.c.bf16 %v269_v9, %v268_v8 }
 0x129   :  { %503 = vmatprep.subr.bf16.mxu1 %v278_v11 }
 0x12a   :  { %504 = vmatpush3.bf16.msra.mxu1 %v278_v11 }
 0x12b   :  { %505 = vmatprep.subr.bf16.mxu1 %v279_v10 }
 0x12e   :  { %506 = vmatpush3.bf16.msra.mxu1 %v279_v10 }
 0x131   :  { %508 = vmatmul.mubr.msk.bf16.vlgmr.msra.gmra.mrb[0].mxu1 %vm314_vm1, %v536_v12 }
 0x204   :  { %v509_v17 = vpop.f32.mrb[0].mxu1 }
 0x205   :  { %v355_v18 = vpop.f32.mrb[1].mxu1  ;;  %v364_v19 = vadd.f32 %v509_v17, %v297_v15 }
 0x206   :  { %v356_v20 = vadd.f32 %v355_v18, %v287_v13  ;;  %v510_v21 = vpop.f32.mrb[2].mxu1 }
 0x207   :  { %v358_v23 = vpop.f32.mrb[3].mxu1  ;;  %v367_v25 = vadd.f32 %v510_v21, %v302_v16  ;;  %v372_v28 = vmax.f32 %v364_v19, 0.0 }
 0x208   :  { %v370_v24 = vmax.f32 %v356_v20, 0.0  ;;  %v359_v26 = vadd.f32 %v358_v23, %v292_v14 }
 0x209   :  { %v373_v31 = vmax.f32 %v367_v25, 0.0  ;;  %v400_v34 = vmul.f32 %v391_v33, %v372_v28 }
 0x20a   :  { %v371_v29 = vmax.f32 %v359_v26, 0.0  ;;  %v398_v30 = vmul.f32 %v381_v22, %v370_v24 }
 0x20b   :  { %v401_v37 = vmul.f32 %v396_v36, %v373_v31 }
 0x20c   :  { %v399_v32 = vmul.f32 %v386_v27, %v371_v29 }
 0x20e   :  { %v402_v35 = vadd.f32 %v399_v32, %v398_v30 }
 0x210   :  { %v403_v38 = vadd.f32 %v402_v35, %v400_v34 }
 0x212   :  { %v404_v40 = vadd.f32 %v403_v38, %v401_v37 }
 0x214   :  { %v405_v41 = vrot.slane %v404_v40, 4 }
 0x216   :  { %v406_v43 = vadd.f32 %v405_v41, %v404_v40 }
 0x218   :  { %v407_v44 = vrot.slane %v406_v43, 2 }
 0x21a   :  { %v408_v46 = vadd.f32 %v407_v44, %v406_v43 }
 0x21c   :  { %v409_v48 = vrot.slane %v408_v46, 1 }
 0x21e   :  { %v410_v50 = vadd.f32 %v409_v48, %v408_v46 }
 0x220   :  { %v421_v51 = vadd.f32 %v420_v49, %v410_v50 }
 0x222   :  { %422 = vst [vmem:[#allocation3] sm:$0x1] %v421_v51 }
 0x223   :  { %548 = shalt.err (!%p545_p4)
}
 0x224   :  { %s549_s13 = scalar_lea.hbm %s737_s7, 16 }
 0x225   :  { %p550_p5 = scmp.ne.s32.totalorder %s737_s7, %s549_s13  ;;  %p553_p6 = scmp.lt.u32.totalorder %s549_s13, %s737_s7 }
 0x227   :  { %p555_p7 = pnand %p553_p6, %p550_p5 }
 0x229   :  { %558 = shalt.err (!%p555_p7)
}
 0x22a   :  { %432 = dma.vmem_to_hbm [thread:$0]  %s430_s9, 16, %s737_s7, [#allocation4]  }
 0x22b   :  { %559 = dma.done.wait [#allocation4], 16  }
 0x22c   :  { %560 = vsyncadd [#allocation4], 4294967280 }
 0x22d   :  { %436 = vsyncpa [#allocation4], 1 }

</bundles_post_ra>
